<compile_context>
chip_gen: v6e
topology: v6e:2x2x1
jax: 0.10.0
libtpu: 0.0.40
codegen_flags: <defaults>
</compile_context>

<pallas_src>
import functools

import jax
import jax.numpy as jnp
from jax import lax
from jax.experimental import pallas as pl
from jax.experimental.pallas import tpu as pltpu


_LANE = 128            # pad every feature dim to a multiple of the lane width
_SUBLANE = 8           # batch-axis granularity
_MAX_BATCH_TILE = 256  # rows per grid step when the batch is large


def _round_up(v, m):
    return ((v + m - 1) // m) * m


# ----------------------------------------------------------------------------
# Fused kernel: runs every Linear + activation layer for one batch tile.
# ----------------------------------------------------------------------------
def _activation(y, act, d_out, dp, lane_idx):
    """Apply activation in f32. Padded lanes [d_out, dp) are handled explicitly."""
    padded = d_out < dp
    if act in ("softmax", "logsoftmax") and padded:
        # Padded lanes must not contribute to the softmax normalization.
        y = jnp.where(lane_idx < d_out, y, -jnp.inf)

    if act == "relu":
        y = jnp.maximum(y, 0.0)
    elif act == "tanh":
        y = jnp.tanh(y)
    elif act == "sigmoid":
        y = jax.nn.sigmoid(y)
    elif act == "lrelu":
        y = jnp.where(y >= 0.0, y, 0.01 * y)      # nn.LeakyReLU default slope
    elif act == "softmax":                         # PyTorch default dim=1
        y = y - jnp.max(y, axis=-1, keepdims=True)
        e = jnp.exp(y)
        y = e * pl.reciprocal(jnp.sum(e, axis=-1, keepdims=True), approx=True)
    elif act == "logsoftmax":
        y = y - jnp.max(y, axis=-1, keepdims=True)
        y = y - jnp.log(jnp.sum(jnp.exp(y), axis=-1, keepdims=True))
    elif act in ("none", None):
        pass
    else:
        raise ValueError(f"unknown activation {act!r}")

    if padded:
        # Keep padded lanes exactly zero so they contribute nothing to the
        # next layer (its padded weight rows are zero) and never go -inf/NaN.
        y = jnp.where(lane_idx < d_out, y, 0.0)
    return y


def _fused_mlp_kernel(x_ref, w_ref, b_ref, o_ref, *, acts, out_dims, dp):
    # x_ref: (TM, Dp) f32      w_ref: (L, Dp, Dp) bf16
    # b_ref: (L, 1, Dp) f32    o_ref: (TM, Dp) f32
    tm = x_ref.shape[0]
    # Hoisted once per grid step; reused by every padded-width layer.
    lane_idx = lax.broadcasted_iota(jnp.int32, (tm, dp), 1)

    h = x_ref[...]                                            # f32 activations
    for l, (act, d_out) in enumerate(zip(acts, out_dims)):
        # bf16 operands into the MXU, f32 accumulation.
        y = jnp.dot(h.astype(jnp.bfloat16), w_ref[l],
                    preferred_element_type=jnp.float32)
        y = y + b_ref[l]                                      # (1, Dp) broadcast
        h = _activation(y, act, d_out, dp, lane_idx)          # f32 VPU/EUP math

    o_ref[...] = h.astype(o_ref.dtype)


def fused_mlp(x_pad, w_packed, b_packed, acts, out_dims):
    """x_pad: (Np, Dp) f32, Np % TM == 0; weights/biases packed & padded."""
    n_pad, dp = x_pad.shape
    num_layers = w_packed.shape[0]
    tm = min(_round_up(n_pad, _SUBLANE), _MAX_BATCH_TILE)
    assert n_pad % tm == 0

    kernel = functools.partial(
        _fused_mlp_kernel, acts=tuple(acts), out_dims=tuple(out_dims), dp=dp)

    return pl.pallas_call(
        kernel,
        out_shape=jax.ShapeDtypeStruct((n_pad, dp), jnp.float32),
        grid=(n_pad // tm,),
        in_specs=[
            pl.BlockSpec((tm, dp), lambda i: (i, 0)),                 # x tile
            pl.BlockSpec((num_layers, dp, dp), lambda i: (0, 0, 0)),  # weights (resident)
            pl.BlockSpec((num_layers, 1, dp), lambda i: (0, 0, 0)),   # biases (resident)
        ],
        out_specs=pl.BlockSpec((tm, dp), lambda i: (i, 0)),
        compiler_params=pltpu.CompilerParams(
            dimension_semantics=("parallel",)),
    )(x_pad, w_packed, b_packed)


# ----------------------------------------------------------------------------
# MLP wrapper (mirrors the PyTorch MLP: Linear+nonlin per entry in `dims`)
# ----------------------------------------------------------------------------
class MLPPallas:
    def __init__(self, in_dim, dims, nonlins, key, dtype=jnp.float32,
                 mxu_dtype=jnp.bfloat16):
        assert len(nonlins) == len(dims)
        self.in_dim = in_dim
        self.out_dim = dims[-1]
        self.dims = list(dims)
        self.nonlins = list(nonlins)
        self.mxu_dtype = mxu_dtype

        all_dims = [in_dim] + list(dims)
        self.params = []
        for d_in, d_out in zip(all_dims[:-1], all_dims[1:]):
            key, kw, kb = jax.random.split(key, 3)
            # Same scale convention as nn.Linear's default init.
            bound = 1.0 / (d_in ** 0.5)
            w = jax.random.uniform(kw, (d_in, d_out), dtype, -bound, bound)
            b = jax.random.uniform(kb, (d_out,), dtype, -bound, bound)
            self.params.append((w, b))

        # Pack once at construction: lane-dense zero-padded (L, Dp, Dp) bf16
        # weights and (L, 1, Dp) f32 biases (no per-call reshapes / tiny DMAs).
        self.dp = max(_round_up(d, _LANE) for d in all_dims)
        num_layers = len(dims)
        wp = jnp.zeros((num_layers, self.dp, self.dp), mxu_dtype)
        bp = jnp.zeros((num_layers, 1, self.dp), jnp.float32)
        for l, ((w, b), d_in, d_out) in enumerate(
                zip(self.params, all_dims[:-1], all_dims[1:])):
            wp = wp.at[l, :d_in, :d_out].set(w.astype(mxu_dtype))
            bp = bp.at[l, 0, :d_out].set(b.astype(jnp.float32))
        self.w_packed = wp
        self.b_packed = bp

        # VMEM-residency budget check: sized against v7x (64 MiB physical,
        # 32 MiB default-scoped), not v5e/v6e's 128 MiB.
        resident_bytes = (
            self.w_packed.size * self.w_packed.dtype.itemsize
            + self.b_packed.size * self.b_packed.dtype.itemsize
            + 4 * _MAX_BATCH_TILE * self.dp * 4)   # 2x double-buffered act tiles
        assert resident_bytes < 24 * 1024 * 1024, (
            "fused MLP weights would not fit comfortably in v7x VMEM; "
            "stream per-layer weight tiles instead")

    def __call__(self, x):
        n, d = x.shape
        assert d == self.in_dim
        tm = min(_round_up(n, _SUBLANE), _MAX_BATCH_TILE)
        n_pad = _round_up(n, tm)
        x_pad = jnp.zeros((n_pad, self.dp), jnp.float32)
        x_pad = x_pad.at[:n, :d].set(x.astype(jnp.float32))
        out = fused_mlp(x_pad, self.w_packed, self.b_packed,
                        self.nonlins, self.dims)
        return out[:n, :self.out_dim]


# ----------------------------------------------------------------------------
# Pure-JAX reference (same bf16-into-MXU / f32-elementwise numerics)
# ----------------------------------------------------------------------------
def _ref_forward(x, params, nonlins, mxu_dtype=jnp.bfloat16):
    out = x.astype(jnp.float32)
    for (w, b), act in zip(params, nonlins):
        out = jnp.dot(out.astype(mxu_dtype), w.astype(mxu_dtype),
                      preferred_element_type=jnp.float32) + b.astype(jnp.float32)
        if act == "relu":
            out = jnp.maximum(out, 0.0)
        elif act == "tanh":
            out = jnp.tanh(out)
        elif act == "sigmoid":
            out = jax.nn.sigmoid(out)
        elif act == "lrelu":
            out = jnp.where(out >= 0.0, out, 0.01 * out)
        elif act == "softmax":
            out = jax.nn.softmax(out, axis=1)
        elif act == "logsoftmax":
            out = jax.nn.log_softmax(out, axis=1)
        elif act in ("none", None):
            pass
    return out


if __name__ == "__main__":
    key = jax.random.PRNGKey(0)
    key_x, key_p = jax.random.split(key)

    # Small, MLP-consistent shapes: N samples with D features.
    N, IN_DIM = 8, 32
    DIMS = [64, 32, 16]
    NONLINS = ["relu", "tanh", "softmax"]

    x = jax.random.normal(key_x, (N, IN_DIM), dtype=jnp.float32)

    mlp = MLPPallas(IN_DIM, DIMS, NONLINS, key_p)
    out = jax.block_until_ready(mlp(x))

    ref = _ref_forward(x, mlp.params, NONLINS)
    assert out.shape == (N, DIMS[-1])
    # bf16 MXU operands + approx-reciprocal softmax -> modest tolerance.
    assert jnp.allclose(out, ref, atol=2e-3, rtol=2e-3), "mismatch vs reference"

    print("KERNEL_OK")
</pallas_src>

<mosaic_0001>
module attributes {stable_mosaic.version = 11 : i64} {
  func.func @_fused_mlp_kernel(%arg0: i32, %arg1: memref<8x128xf32, #tpu.memory_space<vmem>>, %arg2: memref<3x128x128xbf16, #tpu.memory_space<vmem>>, %arg3: memref<3x1x128xf32, #tpu.memory_space<vmem>>, %arg4: memref<8x128xf32, #tpu.memory_space<vmem>>) attributes {dimension_semantics = [#tpu.dimension_semantics<parallel>], iteration_bounds = array<i64: 1>, scalar_prefetch = 0 : i64, scratch_operands = 0 : i64, tpu.core_type = #tpu.core_type<tc>, window_params = [{transform_indices = @transform_0, window_bounds = array<i64: 8, 128>}, {pipeline_mode = #tpu.pipeline_mode<synchronous>, transform_indices = @transform_1, window_bounds = array<i64: 3, 128, 128>}, {pipeline_mode = #tpu.pipeline_mode<synchronous>, transform_indices = @transform_2, window_bounds = array<i64: 3, 1, 128>}, {transform_indices = @transform_3, window_bounds = array<i64: 8, 128>}]} {
    %0 = tpu.iota {dimensions = array<i32: 1>} : vector<8x128xi32>
    %c0 = arith.constant 0 : index
    %c0_0 = arith.constant 0 : index
    %1 = vector.load %arg1[%c0, %c0_0] : memref<8x128xf32, #tpu.memory_space<vmem>>, vector<8x128xf32>
    %2 = arith.truncf %1 : vector<8x128xf32> to vector<8x128xbf16>
    %c0_1 = arith.constant 0 : index
    %c0_2 = arith.constant 0 : index
    %c0_3 = arith.constant 0 : index
    %3 = vector.load %arg2[%c0_1, %c0_2, %c0_3] : memref<3x128x128xbf16, #tpu.memory_space<vmem>>, vector<1x128x128xbf16>
    %4 = vector.shape_cast %3 : vector<1x128x128xbf16> to vector<128x128xbf16>
    %cst = arith.constant dense<0.000000e+00> : vector<8x128xf32>
    %5 = tpu.matmul %2, %4, %cst {dimension_numbers = #tpu.dot_dimension_numbers<[1], [0], [0], [1], [0, 0, 1, 1], [], []>} : vector<8x128xbf16>, vector<128x128xbf16>, vector<8x128xf32> -> vector<8x128xf32>
    %c0_4 = arith.constant 0 : index
    %c0_5 = arith.constant 0 : index
    %c0_6 = arith.constant 0 : index
    %6 = vector.load %arg3[%c0_4, %c0_5, %c0_6] : memref<3x1x128xf32, #tpu.memory_space<vmem>>, vector<1x1x128xf32>
    %7 = vector.shape_cast %6 : vector<1x1x128xf32> to vector<1x128xf32>
    %8 = vector.broadcast %7 : vector<1x128xf32> to vector<8x128xf32>
    %9 = arith.addf %5, %8 : vector<8x128xf32>
    %cst_7 = arith.constant 0.000000e+00 : f32
    %10 = vector.broadcast %cst_7 : f32 to vector<8x128xf32>
    %11 = arith.maximumf %9, %10 : vector<8x128xf32>
    %c64_i32 = arith.constant 64 : i32
    %12 = vector.broadcast %c64_i32 : i32 to vector<8x128xi32>
    %13 = arith.cmpi slt, %0, %12 : vector<8x128xi32>
    %cst_8 = arith.constant 0.000000e+00 : f32
    %14 = vector.broadcast %cst_8 : f32 to vector<8x128xf32>
    %15 = arith.select %13, %11, %14 : vector<8x128xi1>, vector<8x128xf32>
    %16 = arith.truncf %15 : vector<8x128xf32> to vector<8x128xbf16>
    %c1 = arith.constant 1 : index
    %c0_9 = arith.constant 0 : index
    %c0_10 = arith.constant 0 : index
    %17 = vector.load %arg2[%c1, %c0_9, %c0_10] : memref<3x128x128xbf16, #tpu.memory_space<vmem>>, vector<1x128x128xbf16>
    %18 = vector.shape_cast %17 : vector<1x128x128xbf16> to vector<128x128xbf16>
    %cst_11 = arith.constant dense<0.000000e+00> : vector<8x128xf32>
    %19 = tpu.matmul %16, %18, %cst_11 {dimension_numbers = #tpu.dot_dimension_numbers<[1], [0], [0], [1], [0, 0, 1, 1], [], []>} : vector<8x128xbf16>, vector<128x128xbf16>, vector<8x128xf32> -> vector<8x128xf32>
    %c1_12 = arith.constant 1 : index
    %c0_13 = arith.constant 0 : index
    %c0_14 = arith.constant 0 : index
    %20 = vector.load %arg3[%c1_12, %c0_13, %c0_14] : memref<3x1x128xf32, #tpu.memory_space<vmem>>, vector<1x1x128xf32>
    %21 = vector.shape_cast %20 : vector<1x1x128xf32> to vector<1x128xf32>
    %22 = vector.broadcast %21 : vector<1x128xf32> to vector<8x128xf32>
    %23 = arith.addf %19, %22 : vector<8x128xf32>
    %24 = math.tanh %23 : vector<8x128xf32>
    %c32_i32 = arith.constant 32 : i32
    %25 = vector.broadcast %c32_i32 : i32 to vector<8x128xi32>
    %26 = arith.cmpi slt, %0, %25 : vector<8x128xi32>
    %cst_15 = arith.constant 0.000000e+00 : f32
    %27 = vector.broadcast %cst_15 : f32 to vector<8x128xf32>
    %28 = arith.select %26, %24, %27 : vector<8x128xi1>, vector<8x128xf32>
    %29 = arith.truncf %28 : vector<8x128xf32> to vector<8x128xbf16>
    %c2 = arith.constant 2 : index
    %c0_16 = arith.constant 0 : index
    %c0_17 = arith.constant 0 : index
    %30 = vector.load %arg2[%c2, %c0_16, %c0_17] : memref<3x128x128xbf16, #tpu.memory_space<vmem>>, vector<1x128x128xbf16>
    %31 = vector.shape_cast %30 : vector<1x128x128xbf16> to vector<128x128xbf16>
    %cst_18 = arith.constant dense<0.000000e+00> : vector<8x128xf32>
    %32 = tpu.matmul %29, %31, %cst_18 {dimension_numbers = #tpu.dot_dimension_numbers<[1], [0], [0], [1], [0, 0, 1, 1], [], []>} : vector<8x128xbf16>, vector<128x128xbf16>, vector<8x128xf32> -> vector<8x128xf32>
    %c2_19 = arith.constant 2 : index
    %c0_20 = arith.constant 0 : index
    %c0_21 = arith.constant 0 : index
    %33 = vector.load %arg3[%c2_19, %c0_20, %c0_21] : memref<3x1x128xf32, #tpu.memory_space<vmem>>, vector<1x1x128xf32>
    %34 = vector.shape_cast %33 : vector<1x1x128xf32> to vector<1x128xf32>
    %35 = vector.broadcast %34 : vector<1x128xf32> to vector<8x128xf32>
    %36 = arith.addf %32, %35 : vector<8x128xf32>
    %c16_i32 = arith.constant 16 : i32
    %37 = vector.broadcast %c16_i32 : i32 to vector<8x128xi32>
    %38 = arith.cmpi slt, %0, %37 : vector<8x128xi32>
    %cst_22 = arith.constant 0xFF800000 : f32
    %39 = vector.broadcast %cst_22 : f32 to vector<8x128xf32>
    %40 = arith.select %38, %36, %39 : vector<8x128xi1>, vector<8x128xf32>
    %cst_23 = arith.constant dense<0xFF800000> : vector<8xf32>
    %41 = vector.multi_reduction <maximumf>, %40, %cst_23 [1] : vector<8x128xf32> to vector<8xf32>
    %42 = vector.shape_cast %41 : vector<8xf32> to vector<8x1xf32>
    %43 = vector.broadcast %42 : vector<8x1xf32> to vector<8x128xf32>
    %44 = arith.subf %40, %43 : vector<8x128xf32>
    %45 = math.exp %44 : vector<8x128xf32>
    %cst_24 = arith.constant dense<0.000000e+00> : vector<8xf32>
    %46 = vector.multi_reduction <add>, %45, %cst_24 [1] : vector<8x128xf32> to vector<8xf32>
    %47 = vector.shape_cast %46 : vector<8xf32> to vector<8x1xf32>
    %48 = tpu.reciprocal %47 {approx = true} : vector<8x1xf32> -> vector<8x1xf32>
    %49 = vector.broadcast %48 : vector<8x1xf32> to vector<8x128xf32>
    %50 = arith.mulf %45, %49 : vector<8x128xf32>
    %c16_i32_25 = arith.constant 16 : i32
    %51 = vector.broadcast %c16_i32_25 : i32 to vector<8x128xi32>
    %52 = arith.cmpi slt, %0, %51 : vector<8x128xi32>
    %cst_26 = arith.constant 0.000000e+00 : f32
    %53 = vector.broadcast %cst_26 : f32 to vector<8x128xf32>
    %54 = arith.select %52, %50, %53 : vector<8x128xi1>, vector<8x128xf32>
    %c0_27 = arith.constant 0 : index
    %c0_28 = arith.constant 0 : index
    %55 = vector.load %arg4[%c0_27, %c0_28] : memref<8x128xf32, #tpu.memory_space<vmem>>, vector<8x128xf32>
    tpu.vector_store %arg4[%c0_27, %c0_28], %54 {strides = array<i32>} : memref<8x128xf32, #tpu.memory_space<vmem>>, vector<8x128xf32>,
    return
  }
  func.func @transform_0(%arg0: i32) -> (i32, i32) {
    %c0_i32 = arith.constant 0 : i32
    %c0_i32_0 = arith.constant 0 : i32
    return %arg0, %c0_i32 : i32, i32
  }
  func.func @transform_1(%arg0: i32) -> (i32, i32, i32) {
    %c0_i32 = arith.constant 0 : i32
    %c0_i32_0 = arith.constant 0 : i32
    %c0_i32_1 = arith.constant 0 : i32
    %c0_i32_2 = arith.constant 0 : i32
    return %c0_i32, %c0_i32_0, %c0_i32_1 : i32, i32, i32
  }
  func.func @transform_2(%arg0: i32) -> (i32, i32, i32) {
    %c0_i32 = arith.constant 0 : i32
    %c0_i32_0 = arith.constant 0 : i32
    %c0_i32_1 = arith.constant 0 : i32
    %c0_i32_2 = arith.constant 0 : i32
    return %c0_i32, %c0_i32_0, %c0_i32_1 : i32, i32, i32
  }
  func.func @transform_3(%arg0: i32) -> (i32, i32) {
    %c0_i32 = arith.constant 0 : i32
    %c0_i32_0 = arith.constant 0 : i32
    return %arg0, %c0_i32 : i32, i32
  }
}

</mosaic_0001>

<bundles_post_ra>
// kernel: tpu_custom_call.1
= control target key start
LH: loop header
LB: loop body
LE: loop exit
PB: predicated region body
PF: predicated region fallthrough
CT: control target
= control target key end

     0   :  { %8 = vsyncpa [#allocation3], 0  ;;  %s722_s0 = inlined_call_operand.hbm [shape: f32[8,128], index: 0, kind: input, shape index: {}]   ;;  %s723_s1 = inlined_call_operand.hbm [shape: bf16[3,128,128], index: 1, kind: input, shape index: {}]   ;;  %s724_s2 = inlined_call_operand.vmem [shape: f32[3,1,128], index: 2, kind: input, shape index: {}]   ;;  %s725_s3 = inlined_call_operand.hbm [shape: f32[8,128], index: 3, kind: output, shape index: {}]  }
   0x1   :  { %9 = vsyncpa [#allocation6], 0 }
   0x2   :  { %10 = vsyncpa [#allocation4], 0  ;;  %s645_s12 = smov [#allocation2]   ;;  %s646_s14 = smov [#allocation5]  }
   0x3   :  { %s17_s13 = sshll.u32 %s645_s12, 4  ;;  %s26_s15 = sshll.u32 %s646_s14, 4  ;;  %s18_s13 = int_to_ptr.vmem [resolvable:$true] %s17_s13  ;;  %s27_s15 = int_to_ptr.vmem [resolvable:$true] %s26_s15 }
   0x4   :  { %s587_s16 = scalar_lea.vmem %s18_s13, 128  ;;  %p592_p1 = scmp.lt.s32.totalorder %s18_s13, %s18_s13 }
   0x5   :  { %p588_p0 = scmp.ne.s32.totalorder %s18_s13, %s587_s16  ;;  %p593_p2 = scmp.lt.s32.totalorder %s587_s16, %s587_s16 }
   0x7   :  { %p594_p3 = por %p593_p2, %p592_p1 }
   0x9   :  { %p595_p4 = pnand %p594_p3, %p588_p0 }
   0xb   :  { %598 = shalt.err (!%p595_p4)
}
   0xc   :  { %20 = dma.hbm_to_vmem [thread:$0]  %s722_s0, 128, %s18_s13, [#allocation3]  }
   0xd   :  { %s607_s19 = scalar_lea.vmem %s27_s15, 3072  ;;  %p612_p6 = scmp.lt.s32.totalorder %s27_s15, %s27_s15 }
   0xe   :  { %p608_p5 = scmp.ne.s32.totalorder %s27_s15, %s607_s19  ;;  %p613_p7 = scmp.lt.s32.totalorder %s607_s19, %s607_s19 }
  0x10   :  { %p614_p8 = por %p613_p7, %p612_p6 }
  0x12   :  { %p615_p9 = pnand %p614_p8, %p608_p5 }
  0x14   :  { %618 = shalt.err (!%p615_p9)
}
  0x15   :  { %s647_s20 = smov 64   ;;  %s648_s21 = smov 4  }
  0x16   :  { %32 = dma.hbm_to_vmem [thread:$0]  %s723_s1, 3072, %s27_s15, [#allocation6], %s647_s20, %s647_s20, %s648_s21  }
  0x17   :  { %639 = dma.done.wait [#allocation3], 128  }
  0x18   :  { %640 = vsyncadd [#allocation3], 4294967168 }
  0x19   :  { %641 = dma.done.wait [#allocation6], 3072  }
  0x1a   :  { %642 = vsyncadd [#allocation6], 4294964224  ;;  %v649_v0 = vmov 0.0   ;;  %vm650_vm0 = vmmov 0   ;;  %v549_v1 = vld [vmem:[#allocation5 + $0x38] sm:$0xff]   ;;  %v550_v2 = vld [vmem:[#allocation5 + $0x30] sm:$0xff]   ;;  %v42_v22 = vlaneseq }
  0x1b   :  { %482 = vmatprep.subr.bf16.mxu0 %v649_v0  ;;  %498 = vmatprep.mubr.msk.bf16.mxu0 %vm650_vm0, %v649_v0  ;;  %v551_v3 = vld [vmem:[#allocation5 + $0x28] sm:$0xff]   ;;  %v557_v4 = vld [vmem:[#allocation5 + $0x78] sm:$0xff]   ;;  %v552_v5 = vld [vmem:[#allocation5 + $0x20] sm:$0xff]   ;;  %s651_s28 = smov [#allocation7]  }
  0x1c   :  { %502 = vmatprep.subr.bf16.mxu1 %v649_v0  ;;  %518 = vmatprep.mubr.msk.bf16.mxu1 %vm650_vm0, %v649_v0  ;;  %v558_v6 = vld [vmem:[#allocation5 + $0x70] sm:$0xff]   ;;  %v553_v7 = vld [vmem:[#allocation5 + $0x18] sm:$0xff]   ;;  %v559_v8 = vld [vmem:[#allocation5 + $0x68] sm:$0xff]   ;;  %v43_v23 = vand.u32 127, %v42_v22  ;;  %s410_s29 = sshll.u32 %s651_s28, 4  ;;  %s411_s29 = int_to_ptr.vmem [resolvable:$true] %s410_s29 }
  0x1d   :  { %483 = vmatpush3.bf16.msra.mxu0 %v549_v1  ;;  %503 = vmatpush3.bf16.msra.mxu1 %v557_v4  ;;  %v554_v9 = vld [vmem:[#allocation5 + $0x10] sm:$0xff]   ;;  %v560_v10 = vld [vmem:[#allocation5 + $0x60] sm:$0xff]   ;;  %v555_v11 = vld [vmem:[#allocation5 + $0x8] sm:$0xff]   ;;  %p624_p11 = scmp.lt.s32.totalorder %s411_s29, %s411_s29 }
  0x1e   :  { %484 = vmatprep.subr.bf16.mxu0 %v649_v0  ;;  %504 = vmatprep.subr.bf16.mxu1 %v649_v0  ;;  %v561_v12 = vld [vmem:[#allocation5 + $0x58] sm:$0xff]   ;;  %v556_v13 = vld [vmem:[#allocation5] sm:$0xff]   ;;  %v562_v15 = vld [vmem:[#allocation5 + $0x50] sm:$0xff]   ;;  %vm158_vm1 = vcmp.lt.s32.totalorder %v43_v23, 64  ;;  %vm275_vm3 = vcmp.lt.s32.totalorder %v43_v23, 32  ;;  %vm391_vm5 = vcmp.lt.s32.totalorder %v43_v23, 16 }
  0x1f   :  { %v44_v14 = vld [vmem:[#allocation2] sm:$0xff]  ;;  %v563_v17 = vld [vmem:[#allocation5 + $0x48] sm:$0xff]   ;;  %v564_v18 = vld [vmem:[#allocation5 + $0x40] sm:$0xff]  }
  0x20   :  { %v45_v16 = vpack.c.bf16 %v44_v14, %v44_v14  ;;  %v565_v19 = vld [vmem:[#allocation5 + $0xb8] sm:$0xff]   ;;  %v566_v20 = vld [vmem:[#allocation5 + $0xb0] sm:$0xff]   ;;  %v567_v21 = vld [vmem:[#allocation5 + $0xa8] sm:$0xff]  }
  0x21   :  { %485 = vmatpush3.bf16.msra.mxu0 %v550_v2  ;;  %505 = vmatpush3.bf16.msra.mxu1 %v558_v6  ;;  %v420_v24 = vld [vmem:[%s724_s2] ss:$0 sm:$0xff]  ;;  %vm439_vm2 = vmpackc.low %vm158_vm1, %vm158_vm1  ;;  %v568_v32 = vld [vmem:[#allocation5 + $0xa0] sm:$0xff]  }
  0x22   :  { %486 = vmatprep.subr.bf16.mxu0 %v649_v0  ;;  %506 = vmatprep.subr.bf16.mxu1 %v649_v0  ;;  %v569_v33 = vld [vmem:[#allocation5 + $0x98] sm:$0xff]   ;;  %v570_v34 = vld [vmem:[#allocation5 + $0x90] sm:$0xff]   ;;  %v571_v35 = vld [vmem:[#allocation5 + $0x88] sm:$0xff]  }
  0x23   :  { %v572_v36 = vld [vmem:[#allocation5 + $0x80] sm:$0xff]   ;;  %v430_v37 = vld [vmem:[%s724_s2 + $0x1] ss:$0 sm:$0xff]  ;;  %vm452_vm4 = vmpackc.low %vm275_vm3, %vm275_vm3 }
  0x24   :  { %v443_v45 = vld [vmem:[%s724_s2 + $0x2] ss:$0 sm:$0xff]  ;;  %s619_s2 = scalar_lea.vmem %s411_s29, 128 }
  0x25   :  { %487 = vmatpush3.bf16.msra.mxu0 %v551_v3  ;;  %507 = vmatpush3.bf16.msra.mxu1 %v559_v8  ;;  %p620_p10 = scmp.ne.s32.totalorder %s411_s29, %s619_s2  ;;  %p625_p12 = scmp.lt.s32.totalorder %s619_s2, %s619_s2 }
  0x26   :  { %488 = vmatprep.subr.bf16.mxu0 %v649_v0  ;;  %508 = vmatprep.subr.bf16.mxu1 %v649_v0 }
  0x27   :  { %p626_p13 = por %p625_p12, %p624_p11 }
  0x29   :  { %489 = vmatpush3.bf16.msra.mxu0 %v552_v5  ;;  %509 = vmatpush3.bf16.msra.mxu1 %v560_v10  ;;  %p627_p0 = pnand %p626_p13, %p620_p10 }
  0x2a   :  { %490 = vmatprep.subr.bf16.mxu0 %v649_v0  ;;  %510 = vmatprep.subr.bf16.mxu1 %v649_v0 }
  0x2d   :  { %491 = vmatpush3.bf16.msra.mxu0 %v553_v7  ;;  %511 = vmatpush3.bf16.msra.mxu1 %v561_v12 }
  0x2e   :  { %492 = vmatprep.subr.bf16.mxu0 %v649_v0  ;;  %512 = vmatprep.subr.bf16.mxu1 %v649_v0 }
  0x31   :  { %493 = vmatpush3.bf16.msra.mxu0 %v554_v9  ;;  %513 = vmatpush3.bf16.msra.mxu1 %v562_v15 }
  0x32   :  { %494 = vmatprep.subr.bf16.mxu0 %v649_v0  ;;  %514 = vmatprep.subr.bf16.mxu1 %v649_v0 }
  0x35   :  { %495 = vmatpush3.bf16.msra.mxu0 %v555_v11  ;;  %515 = vmatpush3.bf16.msra.mxu1 %v563_v17 }
  0x36   :  { %496 = vmatprep.subr.bf16.mxu0 %v649_v0  ;;  %516 = vmatprep.subr.bf16.mxu1 %v649_v0 }
  0x39   :  { %497 = vmatpush3.bf16.msra.mxu0 %v556_v13  ;;  %517 = vmatpush3.bf16.msra.mxu1 %v564_v18 }
  0x3a   :  { %522 = vmatprep.subr.bf16.mxu0 %v649_v0 }
  0x3c   :  { %499 = vmatmul.mubr.bf16.vlgmr.msra.gmra.mxu0 %v45_v16 }
  0x3d   :  { %538 = vmatprep.mubr.msk.bf16.mxu0 %vm650_vm0, %v649_v0  ;;  %523 = vmatpush3.bf16.msra.mxu0 %v565_v19 }
  0x3e   :  { %524 = vmatprep.subr.bf16.mxu0 %v649_v0 }
  0x41   :  { %525 = vmatpush3.bf16.msra.mxu0 %v566_v20 }
  0x42   :  { %526 = vmatprep.subr.bf16.mxu0 %v649_v0 }
  0x45   :  { %527 = vmatpush3.bf16.msra.mxu0 %v567_v21 }
  0x46   :  { %528 = vmatprep.subr.bf16.mxu0 %v649_v0 }
  0x49   :  { %529 = vmatpush3.bf16.msra.mxu0 %v568_v32 }
  0x4a   :  { %530 = vmatprep.subr.bf16.mxu0 %v649_v0 }
  0x4d   :  { %531 = vmatpush3.bf16.msra.mxu0 %v569_v33 }
  0x4e   :  { %532 = vmatprep.subr.bf16.mxu0 %v649_v0 }
  0x51   :  { %533 = vmatpush3.bf16.msra.mxu0 %v570_v34 }
  0x52   :  { %534 = vmatprep.subr.bf16.mxu0 %v649_v0 }
  0x55   :  { %535 = vmatpush3.bf16.msra.mxu0 %v571_v35 }
  0x56   :  { %536 = vmatprep.subr.bf16.mxu0 %v649_v0 }
  0x59   :  { %537 = vmatpush3.bf16.msra.mxu0 %v572_v36 }
  0xfc   :  { %v151_v25 = vpop.f32.mrf.mxu0 }
  0xfd   :  { %v152_v26 = vadd.f32 %v420_v24, %v151_v25 }
  0xfe   :  { %v500_v27 = vpop.f32.mrf.mxu0 }
  0xff   :  { %v157_v28 = vmax.f32 %v152_v26, 0.0 }
 0x100   :  { %v154_v29 = vpop.f32.mrf.mxu0 }
 0x101   :  { %v440_v30 = vpack.c.bf16 %v157_v28, %v157_v28 }
 0x102   :  { %v501_v31 = vpop.f32.mrf.mxu0 }
 0x103   :  { %519 = vmatmul.mubr.msk.bf16.vlgmr.msra.gmra.mxu1 %vm439_vm2, %v440_v30 }
 0x1c3   :  { %v268_v38 = vpop.f32.mrf.mxu1 }
 0x1c4   :  { %v269_v39 = vadd.f32 %v430_v37, %v268_v38 }
 0x1c5   :  { %v520_v40 = vpop.f32.mrf.mxu1 }
 0x1c6   :  { %573 = vtanh.f32 %v269_v39 }
 0x1c7   :  { %v271_v41 = vpop.f32.mrf.mxu1 }
 0x1c9   :  { %v521_v42 = vpop.f32.mrf.mxu1 }
 0x1d3   :  { %v574_v43 = vpop.eup %573 }
 0x1d4   :  { %v453_v44 = vpack.c.bf16 %v574_v43, %v574_v43 }
 0x1d6   :  { %539 = vmatmul.mubr.msk.bf16.vlgmr.msra.gmra.mxu0 %vm452_vm4, %v453_v44 }
 0x296   :  { %v385_v46 = vpop.f32.mrf.mxu0 }
 0x297   :  { %v386_v47 = vadd.f32 %v443_v45, %v385_v46 }
 0x298   :  { %v540_v48 = vpop.f32.mrf.mxu0 }
 0x299   :  { %v392_v49 = vsel %vm391_vm5, %v386_v47, -inf }
 0x29a   :  { %393 = vmax.xlane.f32.xlu0 %v392_v49  ;;  %v388_v50 = vpop.f32.mrf.mxu0 }
 0x29c   :  { %v541_v51 = vpop.f32.mrf.mxu0 }
 0x323   :  { %v394_v52 = vpop.xlane.xlu0 %393 }
 0x324   :  { %v395_v53 = vsub.f32 %v392_v49, %v394_v52 }
 0x326   :  { %v396_v54 = vmul.f32 1.442695, %v395_v53 }
 0x328   :  { %575 = vpow2.f32 %v396_v54 }
 0x335   :  { %v576_v55 = vpop.eup %575 }
 0x336   :  { %398 = vadd.xlane.f32.xlu0 %v576_v55 }
 0x3bf   :  { %v399_v56 = vpop.xlane.xlu0 %398 }
 0x3c0   :  { %577 = vrcp.f32 %v399_v56 }
 0x3cd   :  { %v578_v57 = vpop.eup %577 }
 0x3ce   :  { %v401_v58 = vmul.f32 %v578_v57, %v576_v55 }
 0x3d0   :  { %v402_v59 = vsel %vm391_vm5, %v401_v58, 0.0 }
 0x3d1   :  { %403 = vst [vmem:[#allocation7] sm:$0xff] %v402_v59 }
 0x3d2   :  { %630 = shalt.err (!%p627_p0)
}
 0x3d3   :  { %413 = dma.vmem_to_hbm [thread:$0]  %s411_s29, 128, %s725_s3, [#allocation4]  }
 0x3d4   :  { %643 = dma.done.wait [#allocation4], 128  }
 0x3d5   :  { %644 = vsyncadd [#allocation4], 4294967168 }
 0x3d6   :  { %417 = vsyncpa [#allocation3], 1 }
 0x3d7   :  { %418 = vsyncpa [#allocation6], 1 }
 0x3d8   :  { %419 = vsyncpa [#allocation4], 1 }

</bundles_post_ra>
